<compile_context>
chip_gen: v7x
topology: tpu7x:2x2x1
jax: 0.10.0
libtpu: 0.0.40
codegen_flags: <defaults>
</compile_context>

<pallas_src>
import functools

import jax
import jax.numpy as jnp
from jax.experimental import pallas as pl
from jax.experimental.pallas import tpu as pltpu


def _round_up(n, m):
    return ((n + m - 1) // m) * m


def _pick_group(e, sub_bp, max_rows=256):
    """Pick estimators-per-grid-step g (g | e).

    Prefer >= 2 grid steps (so the parallel axis can use both v7x TensorCores)
    with the largest row block <= max_rows; fall back to a single fused step.
    """
    best = None
    for g in range(e, 0, -1):
        if e % g:
            continue
        rows = g * sub_bp
        if rows > max_rows:
            continue
        if e // g >= 2:
            return g
        if best is None:
            best = g
    return best if best is not None else 1


def _be_mlp_kernel(g, sub_b, shared,
                   x_ref, r1_ref, s1_ref, b1_ref, r2_ref, s2_ref, b2_ref,
                   w1_ref, w2_ref, o_ref):
    """One grid step = one contiguous group of g ensemble members.

    x_ref:   (sub_b, Fp) shared input (eval / repeat) or (g*sub_b, Fp) block.
    r/s/b:   (1, g, feat) per-group factor tables, expanded in-kernel.
    w1/w2:   full padded weights, resident once in VMEM (single-buffered).
    """
    fp = x_ref.shape[-1]
    hp = w1_ref.shape[-1]
    op = w2_ref.shape[-1]
    rows = g * sub_b

    r1 = r1_ref[0]                                   # (g, Fp)
    s1 = s1_ref[0]                                   # (g, Hp)
    b1 = b1_ref[0]                                   # (g, Hp)
    r2 = r2_ref[0]                                   # (g, Hp)
    s2 = s2_ref[0]                                   # (g, Op)
    b2 = b2_ref[0]                                   # (g, Op)

    x = x_ref[...]
    if shared:
        x3 = x[None, :, :]                           # (1, sub_b, Fp) -> bcast over g
    else:
        x3 = x.reshape(g, sub_b, fp)

    # Fold the estimator repeat into the x * r1 multiply (no copy/concat pass).
    xr = (x3 * r1[:, None, :]).reshape(rows, fp)     # f32 elementwise (VPU)

    bf16_dots = w1_ref.dtype == jnp.bfloat16
    prec = None if bf16_dots else jax.lax.Precision.HIGHEST

    # BatchLinear #1: ((x * r1) @ W1) * s1 + b1, then ReLU.
    h = jnp.dot(xr.astype(w1_ref.dtype), w1_ref[...],
                preferred_element_type=jnp.float32, precision=prec)  # (rows, Hp)
    h3 = h.reshape(g, sub_b, hp)
    h3 = jnp.maximum(h3 * s1[:, None, :] + b1[:, None, :], 0.0)

    # BatchLinear #2: ((h * r2) @ W2) * s2 + b2.
    hr = (h3 * r2[:, None, :]).reshape(rows, hp)
    y = jnp.dot(hr.astype(w2_ref.dtype), w2_ref[...],
                preferred_element_type=jnp.float32, precision=prec)  # (rows, Op)
    y3 = y.reshape(g, sub_b, op) * s2[:, None, :] + b2[:, None, :]

    o_ref[...] = y3.reshape(rows, op).astype(o_ref.dtype)


def prepare_params(params, num_estimators, dot_dtype=jnp.bfloat16):
    """One-time padding / casting (hoisted out of the per-forward path)."""
    w1, r1, s1, b1, w2, r2, s2, b2 = params
    f_in, hidden = w1.shape
    out_f = w2.shape[1]
    e = num_estimators

    fp = _round_up(f_in, 128)
    hp = _round_up(hidden, 128)
    op = _round_up(out_f, 128)

    def pad2(a, rows, cols):
        return jnp.pad(a, ((0, rows - a.shape[0]), (0, cols - a.shape[1])))

    return {
        "w1": pad2(w1, fp, hp).astype(dot_dtype),
        "w2": pad2(w2, hp, op).astype(dot_dtype),
        "r1": pad2(r1, e, fp),      # f32: rank-1 factors stay on the VPU path
        "s1": pad2(s1, e, hp),
        "b1": pad2(b1, e, hp),
        "r2": pad2(r2, e, hp),
        "s2": pad2(s2, e, op),
        "b2": pad2(b2, e, op),
        "dims": (f_in, hidden, out_f, fp, hp, op),
    }


def batch_ensemble_forward(x, prep, num_estimators, *, training=False,
                           repeat_training_inputs=False, unpad_output=True):
    """BatchEnsemble.forward: (implicit) repeat + BatchLinear->ReLU->BatchLinear."""
    f_in, hidden, out_f, fp, hp, op = prep["dims"]
    e = num_estimators

    share_input = (not training) or repeat_training_inputs
    if share_input:
        sub_b = x.shape[0]
    else:
        assert x.shape[0] % e == 0
        sub_b = x.shape[0] // e

    # Sublane-align the per-estimator sub-batch (zero rows, sliced off later).
    sub_bp = _round_up(max(sub_b, 1), 8)
    g = _pick_group(e, sub_bp)
    n_groups = e // g
    rows = g * sub_bp
    mbp = e * sub_bp

    if share_input:
        xp = jnp.pad(x, ((0, sub_bp - sub_b), (0, fp - f_in)))
        x_spec = pl.BlockSpec((sub_bp, fp), lambda i: (0, 0))
    else:
        x3 = x.reshape(e, sub_b, f_in)
        xp = jnp.pad(x3, ((0, 0), (0, sub_bp - sub_b),
                          (0, fp - f_in))).reshape(mbp, fp)
        x_spec = pl.BlockSpec((rows, fp), lambda i: (i, 0))

    # Per-group factor tables: (n_groups, g, feat) so each block's trailing two
    # dims equal the full array dims (sublane-legal even for small g).
    tbl = lambda a: a.reshape(n_groups, g, a.shape[-1])
    r1t, s1t, b1t = tbl(prep["r1"]), tbl(prep["s1"]), tbl(prep["b1"])
    r2t, s2t, b2t = tbl(prep["r2"]), tbl(prep["s2"]), tbl(prep["b2"])

    spec_f = pl.BlockSpec((1, g, fp), lambda i: (i, 0, 0))
    spec_h = pl.BlockSpec((1, g, hp), lambda i: (i, 0, 0))
    spec_o = pl.BlockSpec((1, g, op), lambda i: (i, 0, 0))
    # Whole weights resident once in VMEM: single-buffered, DMA'd before the grid.
    w_spec = pl.BlockSpec(memory_space=pltpu.MemorySpace.VMEM)
    out_spec = pl.BlockSpec((rows, op), lambda i: (i, 0))

    # Per-step VMEM estimate (bytes): 2x-buffered blocked streams (f32) +
    # single-buffered weights + in-flight activations; generous 2x margin.
    wbytes = jnp.dtype(prep["w1"].dtype).itemsize
    blocked = rows * fp + g * (fp + 3 * hp + 2 * op) + rows * op
    act = rows * (fp + 2 * hp + op)
    est = 4 * (2 * blocked + act) + wbytes * (fp * hp + hp * op)
    vmem_limit = int(min(max(2 * est, 16 << 20), 64 << 20))

    kernel = functools.partial(_be_mlp_kernel, g, sub_bp, share_input)

    # TODO(synk): add a K-tiled reduction grid axis ("arbitrary", f32 VMEM
    # accumulator) for layer widths whose full weights do not fit VMEM.
    out_padded = pl.pallas_call(
        kernel,
        out_shape=jax.ShapeDtypeStruct((mbp, op), jnp.float32),
        grid=(n_groups,),
        in_specs=[x_spec, spec_f, spec_h, spec_h, spec_h, spec_o, spec_o,
                  w_spec, w_spec],
        out_specs=out_spec,
        compiler_params=pltpu.CompilerParams(
            dimension_semantics=("parallel",),
            vmem_limit_bytes=vmem_limit),
    )(xp, r1t, s1t, b1t, r2t, s2t, b2t, prep["w1"], prep["w2"])

    if not unpad_output:
        return out_padded  # (e*sub_bp, Op) lane-dense layout for fused consumers
    return out_padded.reshape(e, sub_bp, op)[:, :sub_b, :out_f].reshape(
        e * sub_b, out_f)


def reference_forward(x, params, num_estimators):
    """Pure-JAX f32 reference (repeat + BatchLinear MLP), HIGHEST precision."""
    w1, r1, s1, b1, w2, r2, s2, b2 = params
    xm = jnp.tile(x, (num_estimators, 1))
    sub_b = x.shape[0]
    rep = lambda p: jnp.repeat(p, sub_b, axis=0)
    hi = jax.lax.Precision.HIGHEST
    h = jnp.dot(xm * rep(r1), w1, precision=hi) * rep(s1) + rep(b1)
    h = jnp.maximum(h, 0.0)
    return jnp.dot(h * rep(r2), w2, precision=hi) * rep(s2) + rep(b2)


def init_params(key, f_in, hidden, out_f, num_estimators):
    ks = jax.random.split(key, 8)
    w1 = jax.random.normal(ks[0], (f_in, hidden), jnp.float32) * 0.1
    r1 = 1.0 + 0.1 * jax.random.normal(ks[1], (num_estimators, f_in), jnp.float32)
    s1 = 1.0 + 0.1 * jax.random.normal(ks[2], (num_estimators, hidden), jnp.float32)
    b1 = 0.01 * jax.random.normal(ks[3], (num_estimators, hidden), jnp.float32)
    w2 = jax.random.normal(ks[4], (hidden, out_f), jnp.float32) * 0.1
    r2 = 1.0 + 0.1 * jax.random.normal(ks[5], (num_estimators, hidden), jnp.float32)
    s2 = 1.0 + 0.1 * jax.random.normal(ks[6], (num_estimators, out_f), jnp.float32)
    b2 = 0.01 * jax.random.normal(ks[7], (num_estimators, out_f), jnp.float32)
    return (w1, r1, s1, b1, w2, r2, s2, b2)


if __name__ == "__main__":
    # TODO(synk): _convert_layers / nn.Module surgery and BatchConv2d are
    # Python-level module plumbing; the converted model (BatchLinear -> ReLU ->
    # BatchLinear) is built directly and eval-mode batch repeat is applied.
    num_estimators = 4
    batch, f_in, hidden, out_f = 2, 32, 64, 16

    key = jax.random.PRNGKey(0)
    k_x, k_p = jax.random.split(key)
    x = jax.random.normal(k_x, (batch, f_in), jnp.float32)
    params = init_params(k_p, f_in, hidden, out_f, num_estimators)

    prep = prepare_params(params, num_estimators)          # one-time prep
    y = batch_ensemble_forward(x, prep, num_estimators)    # eval mode -> repeat
    y = jax.block_until_ready(y)

    y_ref = reference_forward(x, params, num_estimators)
    assert y.shape == (num_estimators * batch, out_f)
    max_err = float(jnp.max(jnp.abs(y - y_ref)))
    assert jnp.allclose(y, y_ref, atol=5e-2, rtol=5e-2), f"max_err={max_err}"

    print("KERNEL_OK")
</pallas_src>

<mosaic_0001>
module attributes {stable_mosaic.version = 11 : i64} {
  func.func @_be_mlp_kernel(%arg0: i32, %arg1: memref<8x128xf32, #tpu.memory_space<vmem>>, %arg2: memref<1x2x128xf32, #tpu.memory_space<vmem>>, %arg3: memref<1x2x128xf32, #tpu.memory_space<vmem>>, %arg4: memref<1x2x128xf32, #tpu.memory_space<vmem>>, %arg5: memref<1x2x128xf32, #tpu.memory_space<vmem>>, %arg6: memref<1x2x128xf32, #tpu.memory_space<vmem>>, %arg7: memref<1x2x128xf32, #tpu.memory_space<vmem>>, %arg8: memref<128x128xbf16, #tpu.memory_space<vmem>>, %arg9: memref<128x128xbf16, #tpu.memory_space<vmem>>, %arg10: memref<16x128xf32, #tpu.memory_space<vmem>>) attributes {dimension_semantics = [#tpu.dimension_semantics<parallel>], iteration_bounds = array<i64: 2>, scalar_prefetch = 0 : i64, scratch_operands = 0 : i64, tpu.core_type = #tpu.core_type<tc>, window_params = [{pipeline_mode = #tpu.pipeline_mode<synchronous>, transform_indices = @transform_0, window_bounds = array<i64: 8, 128>}, {transform_indices = @transform_1, window_bounds = array<i64: 1, 2, 128>}, {transform_indices = @transform_2, window_bounds = array<i64: 1, 2, 128>}, {transform_indices = @transform_3, window_bounds = array<i64: 1, 2, 128>}, {transform_indices = @transform_4, window_bounds = array<i64: 1, 2, 128>}, {transform_indices = @transform_5, window_bounds = array<i64: 1, 2, 128>}, {transform_indices = @transform_6, window_bounds = array<i64: 1, 2, 128>}, {pipeline_mode = #tpu.pipeline_mode<synchronous>, transform_indices = @transform_7, window_bounds = array<i64: 128, 128>}, {pipeline_mode = #tpu.pipeline_mode<synchronous>, transform_indices = @transform_8, window_bounds = array<i64: 128, 128>}, {transform_indices = @transform_9, window_bounds = array<i64: 16, 128>}]} {
    %c0 = arith.constant 0 : index
    %c0_0 = arith.constant 0 : index
    %c0_1 = arith.constant 0 : index
    %0 = vector.load %arg2[%c0, %c0_0, %c0_1] : memref<1x2x128xf32, #tpu.memory_space<vmem>>, vector<1x2x128xf32>
    %1 = vector.shape_cast %0 : vector<1x2x128xf32> to vector<2x128xf32>
    %c0_2 = arith.constant 0 : index
    %c0_3 = arith.constant 0 : index
    %c0_4 = arith.constant 0 : index
    %2 = vector.load %arg3[%c0_2, %c0_3, %c0_4] : memref<1x2x128xf32, #tpu.memory_space<vmem>>, vector<1x2x128xf32>
    %3 = vector.shape_cast %2 : vector<1x2x128xf32> to vector<2x128xf32>
    %c0_5 = arith.constant 0 : index
    %c0_6 = arith.constant 0 : index
    %c0_7 = arith.constant 0 : index
    %4 = vector.load %arg4[%c0_5, %c0_6, %c0_7] : memref<1x2x128xf32, #tpu.memory_space<vmem>>, vector<1x2x128xf32>
    %5 = vector.shape_cast %4 : vector<1x2x128xf32> to vector<2x128xf32>
    %c0_8 = arith.constant 0 : index
    %c0_9 = arith.constant 0 : index
    %c0_10 = arith.constant 0 : index
    %6 = vector.load %arg5[%c0_8, %c0_9, %c0_10] : memref<1x2x128xf32, #tpu.memory_space<vmem>>, vector<1x2x128xf32>
    %7 = vector.shape_cast %6 : vector<1x2x128xf32> to vector<2x128xf32>
    %c0_11 = arith.constant 0 : index
    %c0_12 = arith.constant 0 : index
    %c0_13 = arith.constant 0 : index
    %8 = vector.load %arg6[%c0_11, %c0_12, %c0_13] : memref<1x2x128xf32, #tpu.memory_space<vmem>>, vector<1x2x128xf32>
    %9 = vector.shape_cast %8 : vector<1x2x128xf32> to vector<2x128xf32>
    %c0_14 = arith.constant 0 : index
    %c0_15 = arith.constant 0 : index
    %c0_16 = arith.constant 0 : index
    %10 = vector.load %arg7[%c0_14, %c0_15, %c0_16] : memref<1x2x128xf32, #tpu.memory_space<vmem>>, vector<1x2x128xf32>
    %11 = vector.shape_cast %10 : vector<1x2x128xf32> to vector<2x128xf32>
    %c0_17 = arith.constant 0 : index
    %c0_18 = arith.constant 0 : index
    %12 = vector.load %arg1[%c0_17, %c0_18] : memref<8x128xf32, #tpu.memory_space<vmem>>, vector<8x128xf32>
    %13 = vector.shape_cast %12 : vector<8x128xf32> to vector<1x8x128xf32>
    %14 = vector.shape_cast %1 : vector<2x128xf32> to vector<2x1x128xf32>
    %15 = vector.broadcast %13 : vector<1x8x128xf32> to vector<2x8x128xf32>
    %16 = vector.broadcast %14 : vector<2x1x128xf32> to vector<2x8x128xf32>
    %17 = arith.mulf %15, %16 : vector<2x8x128xf32>
    %18 = vector.shape_cast %17 : vector<2x8x128xf32> to vector<16x128xf32>
    %19 = arith.truncf %18 : vector<16x128xf32> to vector<16x128xbf16>
    %c0_19 = arith.constant 0 : index
    %c0_20 = arith.constant 0 : index
    %20 = vector.load %arg8[%c0_19, %c0_20] : memref<128x128xbf16, #tpu.memory_space<vmem>>, vector<128x128xbf16>
    %cst = arith.constant dense<0.000000e+00> : vector<16x128xf32>
    %21 = tpu.matmul %19, %20, %cst {dimension_numbers = #tpu.dot_dimension_numbers<[1], [0], [0], [1], [0, 0, 1, 1], [], []>} : vector<16x128xbf16>, vector<128x128xbf16>, vector<16x128xf32> -> vector<16x128xf32>
    %22 = vector.shape_cast %21 : vector<16x128xf32> to vector<2x8x128xf32>
    %23 = vector.shape_cast %3 : vector<2x128xf32> to vector<2x1x128xf32>
    %24 = vector.broadcast %23 : vector<2x1x128xf32> to vector<2x8x128xf32>
    %25 = arith.mulf %22, %24 : vector<2x8x128xf32>
    %26 = vector.shape_cast %5 : vector<2x128xf32> to vector<2x1x128xf32>
    %27 = vector.broadcast %26 : vector<2x1x128xf32> to vector<2x8x128xf32>
    %28 = arith.addf %25, %27 : vector<2x8x128xf32>
    %cst_21 = arith.constant 0.000000e+00 : f32
    %29 = vector.broadcast %cst_21 : f32 to vector<2x8x128xf32>
    %30 = arith.maximumf %28, %29 : vector<2x8x128xf32>
    %31 = vector.shape_cast %7 : vector<2x128xf32> to vector<2x1x128xf32>
    %32 = vector.broadcast %31 : vector<2x1x128xf32> to vector<2x8x128xf32>
    %33 = arith.mulf %30, %32 : vector<2x8x128xf32>
    %34 = vector.shape_cast %33 : vector<2x8x128xf32> to vector<16x128xf32>
    %35 = arith.truncf %34 : vector<16x128xf32> to vector<16x128xbf16>
    %c0_22 = arith.constant 0 : index
    %c0_23 = arith.constant 0 : index
    %36 = vector.load %arg9[%c0_22, %c0_23] : memref<128x128xbf16, #tpu.memory_space<vmem>>, vector<128x128xbf16>
    %cst_24 = arith.constant dense<0.000000e+00> : vector<16x128xf32>
    %37 = tpu.matmul %35, %36, %cst_24 {dimension_numbers = #tpu.dot_dimension_numbers<[1], [0], [0], [1], [0, 0, 1, 1], [], []>} : vector<16x128xbf16>, vector<128x128xbf16>, vector<16x128xf32> -> vector<16x128xf32>
    %38 = vector.shape_cast %37 : vector<16x128xf32> to vector<2x8x128xf32>
    %39 = vector.shape_cast %9 : vector<2x128xf32> to vector<2x1x128xf32>
    %40 = vector.broadcast %39 : vector<2x1x128xf32> to vector<2x8x128xf32>
    %41 = arith.mulf %38, %40 : vector<2x8x128xf32>
    %42 = vector.shape_cast %11 : vector<2x128xf32> to vector<2x1x128xf32>
    %43 = vector.broadcast %42 : vector<2x1x128xf32> to vector<2x8x128xf32>
    %44 = arith.addf %41, %43 : vector<2x8x128xf32>
    %45 = vector.shape_cast %44 : vector<2x8x128xf32> to vector<16x128xf32>
    %c0_25 = arith.constant 0 : index
    %c0_26 = arith.constant 0 : index
    %46 = vector.load %arg10[%c0_25, %c0_26] : memref<16x128xf32, #tpu.memory_space<vmem>>, vector<16x128xf32>
    tpu.vector_store %arg10[%c0_25, %c0_26], %45 {strides = array<i32>} : memref<16x128xf32, #tpu.memory_space<vmem>>, vector<16x128xf32>,
    return
  }
  func.func @transform_0(%arg0: i32) -> (i32, i32) {
    %c0_i32 = arith.constant 0 : i32
    %c0_i32_0 = arith.constant 0 : i32
    %c0_i32_1 = arith.constant 0 : i32
    return %c0_i32, %c0_i32_0 : i32, i32
  }
  func.func @transform_1(%arg0: i32) -> (i32, i32, i32) {
    %c0_i32 = arith.constant 0 : i32
    %c0_i32_0 = arith.constant 0 : i32
    %c0_i32_1 = arith.constant 0 : i32
    return %arg0, %c0_i32, %c0_i32_0 : i32, i32, i32
  }
  func.func @transform_2(%arg0: i32) -> (i32, i32, i32) {
    %c0_i32 = arith.constant 0 : i32
    %c0_i32_0 = arith.constant 0 : i32
    %c0_i32_1 = arith.constant 0 : i32
    return %arg0, %c0_i32, %c0_i32_0 : i32, i32, i32
  }
  func.func @transform_3(%arg0: i32) -> (i32, i32, i32) {
    %c0_i32 = arith.constant 0 : i32
    %c0_i32_0 = arith.constant 0 : i32
    %c0_i32_1 = arith.constant 0 : i32
    return %arg0, %c0_i32, %c0_i32_0 : i32, i32, i32
  }
  func.func @transform_4(%arg0: i32) -> (i32, i32, i32) {
    %c0_i32 = arith.constant 0 : i32
    %c0_i32_0 = arith.constant 0 : i32
    %c0_i32_1 = arith.constant 0 : i32
    return %arg0, %c0_i32, %c0_i32_0 : i32, i32, i32
  }
  func.func @transform_5(%arg0: i32) -> (i32, i32, i32) {
    %c0_i32 = arith.constant 0 : i32
    %c0_i32_0 = arith.constant 0 : i32
    %c0_i32_1 = arith.constant 0 : i32
    return %arg0, %c0_i32, %c0_i32_0 : i32, i32, i32
  }
  func.func @transform_6(%arg0: i32) -> (i32, i32, i32) {
    %c0_i32 = arith.constant 0 : i32
    %c0_i32_0 = arith.constant 0 : i32
    %c0_i32_1 = arith.constant 0 : i32
    return %arg0, %c0_i32, %c0_i32_0 : i32, i32, i32
  }
  func.func @transform_7(%arg0: i32) -> (i32, i32) {
    %c0_i32 = arith.constant 0 : i32
    %c0_i32_0 = arith.constant 0 : i32
    %c0_i32_1 = arith.constant 0 : i32
    return %c0_i32, %c0_i32_0 : i32, i32
  }
  func.func @transform_8(%arg0: i32) -> (i32, i32) {
    %c0_i32 = arith.constant 0 : i32
    %c0_i32_0 = arith.constant 0 : i32
    %c0_i32_1 = arith.constant 0 : i32
    return %c0_i32, %c0_i32_0 : i32, i32
  }
  func.func @transform_9(%arg0: i32) -> (i32, i32) {
    %c0_i32 = arith.constant 0 : i32
    %c0_i32_0 = arith.constant 0 : i32
    return %arg0, %c0_i32 : i32, i32
  }
}

</mosaic_0001>

<bundles_post_ra>
// kernel: tpu_custom_call.1
= control target key start
LH: loop header
LB: loop body
LE: loop exit
PB: predicated region body
PF: predicated region fallthrough
CT: control target
= control target key end

     0   :  { %s1887_s0 = inlined_call_operand.hbm [shape: f32[8,128], index: 0, kind: input, shape index: {}]   ;;  %s1888_s1 = inlined_call_operand.hbm [shape: f32[2,2,128], index: 1, kind: input, shape index: {}]   ;;  %s1889_s2 = inlined_call_operand.vmem [shape: f32[2,2,128], index: 2, kind: input, shape index: {}]   ;;  %s1890_s3 = inlined_call_operand.vmem [shape: f32[2,2,128], index: 3, kind: input, shape index: {}]   ;;  %s1891_s4 = inlined_call_operand.vmem [shape: f32[2,2,128], index: 4, kind: input, shape index: {}]   ;;  %s1892_s5 = inlined_call_operand.vmem [shape: f32[2,2,128], index: 5, kind: input, shape index: {}]   ;;  %s1893_s6 = inlined_call_operand.vmem [shape: f32[2,2,128], index: 6, kind: input, shape index: {}]   ;;  %s1894_s7 = inlined_call_operand.hbm [shape: bf16[128,128], index: 7, kind: input, shape index: {}]   ;;  %s1895_s8 = inlined_call_operand.hbm [shape: bf16[128,128], index: 8, kind: input, shape index: {}]   ;;  %s1896_s9 = inlined_call_operand.hbm [shape: f32[32,128], index: 9, kind: output, shape index: {}]  }
   0x1   :  { %1903 = sst [smem:[#allocation18_spill]] %s1896_s9 }
   0x2   :  { %14 = vsyncpa [#allocation3], 0 }
   0x3   :  { %15 = vsyncpa [#allocation6], 0 }
   0x4   :  { %17 = vsyncpa [#allocation6 + $0x1], 0 }
   0x5   :  { %18 = vsyncpa [#allocation9], 0 }
   0x6   :  { %19 = vsyncpa [#allocation4], 0 }
   0x7   :  { %21 = vsyncpa [#allocation4 + $0x1], 0  ;;  %s1549_s30 = smov 0   ;;  %s1551_s10 = smov 0  }
   0x8   :  { %s1553_s11 = smov 0   ;;  %s1555_s12 = smov 0  }
   0x9 LB: > { %1904 = sst [smem:[#allocation16_spill]] %s1473_s30  ;;  %s1570_s13 = sadd.s32 4294967295, %s1485_s12   ;;  %s1485_s12 = sphi %s1555_s12, %s1931_s12   ;;  %s1481_s11 = sphi %s1553_s11, %s1930_s11   ;;  %s1477_s10 = sphi %s1551_s10, %s1929_s10   ;;  %s1473_s30 = sphi %s1549_s30, %s1928_s30  }
   0xa   : > { %s1088_s14 = sadd.s32 4294967294, %s1485_s12   ;;  %p68_p0 = scmp.ne.s32.totalorder %s1477_s10, %s1473_s30 }
   0xb   : > { %p1897_p1 = scmp.eq.s32.totalorder %s1570_s13, 0  ;;  %p270_p3 = scmp.eq.s32.totalorder %s1088_s14, 1 }
   0xc   : > { %p1089_p5 = scmp.ge.s32.totalorder %s1485_s12, 1  ;;  %p277_p7 = scmp.lt.s32.totalorder %s1485_s12, 3 }
   0xd   : > { %p1579_p4 = por %p1897_p1, %p68_p0  ;;  %p1584_p6 = por %p270_p3, %p68_p0 }
   0xe   : > { %p1589_p8 = pnand %p1089_p5, %p277_p7  ;;  %s1487_s18 = smov [#allocation7]  }
   0xf   : > { %s1905_s15 = scalar_select %p1579_p4, 1, 0 }
  0x10   : > { %s1906_s16 = scalar_select %p1584_p6, 1, 0 }
  0x11   : > { %s1908_s17 = scalar_select %p1589_p8, 1, 0 }
  0x12   : > { %1907 = sst [smem:[#allocation17_spill]] %s1906_s16  ;;  %s300_s19 = sshll.u32 %s1487_s18, 4  ;;  %s1593_s19 = int_to_ptr.vmem [resolvable:$true] %s300_s19 }
  0x13   : > { %p1209_p9 = pneg %p1589_p8  ;;  %s1488_s21 = smov [#allocation2]  }
  0x14   : > { %s290_s22 = sshll.u32 %s1488_s21, 4  ;;  %s1489_s23 = smov [#allocation8]   ;;  %s1604_s22 = int_to_ptr.vmem [resolvable:$true] %s290_s22 }
  0x15   : > { %p1600_p11 = pnand %p1209_p9, %p1897_p1  ;;  %s1606_s24 = sshll.u32 %s1489_s23, 4  ;;  %s314_s24 = int_to_ptr.vmem [resolvable:$true] %s1606_s24 }
  0x16   : > { %s1293_s27 = scalar_lea.hbm %s1894_s7, 1024 }
  0x17   : > { %p1294_p12 = scmp.ne.s32.totalorder %s1894_s7, %s1293_s27  ;;  %p1616_p13 = pneg %p1600_p11 }
  0x18   : > { %p1300_p5 = scmp.lt.u32.totalorder %s1293_s27, %s1894_s7 }
  0x19   : > { %p1296_p0 = pnand %p1616_p13, %p1294_p12 }
  0x1b   : > { %p1297_p3 = pneg %p1296_p0 }
  0x1d   : > { %p1302_p7 = pnand %p1300_p5, %p1297_p3 }
  0x1f   : > { %1305 = shalt.err (!%p1302_p7)
}
  0x20   : > { %s1306_s23 = scalar_lea.vmem %s1593_s19, 1024  ;;  %p1314_p2 = scmp.lt.s32.totalorder %s1593_s19, %s1593_s19 }
  0x21   : > { %p1307_p9 = scmp.ne.s32.totalorder %s1593_s19, %s1306_s23  ;;  %p1315_p6 = scmp.lt.s32.totalorder %s1306_s23, %s1306_s23 }
  0x23   : > { %p1309_p10 = pnand %p1307_p9, %p1616_p13  ;;  %p1316_p12 = por %p1315_p6, %p1314_p2 }
  0x25   : > { %p1310_p1 = pneg %p1309_p10 }
  0x27   : > { %p1317_p0 = pnand %p1316_p12, %p1310_p1 }
  0x29   : > { %1320 = shalt.err (!%p1317_p0)
}
  0x2a   : > { %s1490_s25 = smov 64   ;;  %s1491_s26 = smov 4  }
  0x2b   : > { %1215 = dma.hbm_to_vmem [thread:$0]  (!%p1600_p11), %s1894_s7, 1024, %s1593_s19, [#allocation6], %s1490_s25, %s1490_s25, %s1491_s26  }
  0x2c   : > { %s1321_s21 = scalar_lea.hbm %s1887_s0, 128 }
  0x2d   : > { %p1322_p1 = scmp.ne.s32.totalorder %s1887_s0, %s1321_s21  ;;  %p1328_p10 = scmp.lt.u32.totalorder %s1321_s21, %s1887_s0 }
  0x2f   : > { %p1324_p2 = pnand %p1322_p1, %p1616_p13 }
  0x31   : > { %p1325_p6 = pneg %p1324_p2 }
  0x33   : > { %p1330_p3 = pnand %p1328_p10, %p1325_p6 }
  0x35   : > { %1333 = shalt.err (!%p1330_p3)
}
  0x36   : > { %s1334_s19 = scalar_lea.vmem %s1604_s22, 128  ;;  %p1342_p12 = scmp.lt.s32.totalorder %s1604_s22, %s1604_s22 }
  0x37   : > { %p1335_p5 = scmp.ne.s32.totalorder %s1604_s22, %s1334_s19  ;;  %p1343_p0 = scmp.lt.s32.totalorder %s1334_s19, %s1334_s19 }
  0x39   : > { %p1337_p7 = pnand %p1335_p5, %p1616_p13  ;;  %p1344_p1 = por %p1343_p0, %p1342_p12 }
  0x3b   : > { %p1338_p9 = pneg %p1337_p7 }
  0x3d   : > { %p1345_p2 = pnand %p1344_p1, %p1338_p9 }
  0x3f   : > { %1348 = shalt.err (!%p1345_p2)
}
  0x40   : > { %1212 = dma.hbm_to_vmem [thread:$0]  (!%p1600_p11), %s1887_s0, 128, %s1604_s22, [#allocation3]  }
  0x41   : > { %s1349_s28 = scalar_lea.hbm %s1895_s8, 1024 }
  0x42   : > { %p1350_p6 = scmp.ne.s32.totalorder %s1895_s8, %s1349_s28  ;;  %p1356_p5 = scmp.lt.u32.totalorder %s1349_s28, %s1895_s8 }
  0x44   : > { %p1352_p10 = pnand %p1350_p6, %p1616_p13 }
  0x46   : > { %p1353_p3 = pneg %p1352_p10 }
  0x48   : > { %p1358_p7 = pnand %p1356_p5, %p1353_p3 }
  0x4a   : > { %1361 = shalt.err (!%p1358_p7)
}
  0x4b   : > { %s1362_s19 = scalar_lea.vmem %s314_s24, 1024  ;;  %p1370_p1 = scmp.lt.s32.totalorder %s314_s24, %s314_s24 }
  0x4c   : > { %p1363_p9 = scmp.ne.s32.totalorder %s314_s24, %s1362_s19  ;;  %p1371_p2 = scmp.lt.s32.totalorder %s1362_s19, %s1362_s19 }
  0x4e   : > { %p1365_p12 = pnand %p1363_p9, %p1616_p13  ;;  %p1372_p4 = por %p1371_p2, %p1370_p1 }
  0x50   : > { %p1366_p0 = pneg %p1365_p12 }
  0x52   : > { %p1373_p8 = pnand %p1372_p4, %p1366_p0 }
  0x54   : > { %1376 = shalt.err (!%p1373_p8)
}
  0x55   : > { %1218 = dma.hbm_to_vmem [thread:$0]  (!%p1600_p11), %s1895_s8, 1024, %s314_s24, [#allocation9], %s1490_s25, %s1490_s25, %s1491_s26  }
  0x56   : > { %s1686_s20 = sadd.s32 1, %s1485_s12   ;;  %s55_s30 = sadd.s32 1, %s1481_s11 }
  0x57   : > { %s52_s14 = ssub.s32 %s1485_s12, %s1686_s20  ;;  %p62_p8 = scmp.ne.s32.totalorder %s1481_s11, %s1477_s10 }
  0x58   : > { %p53_p4 = scmp.eq.s32.totalorder %s52_s14, 0  ;;  %p63_p13 = scmp.eq.s32.totalorder %s1485_s12, 0 }
  0x59   : > { %p1230_p6 = scmp.lt.s32.totalorder %s1485_s12, 2  ;;  %p1911_p3 = scmp.eq.s32.totalorder %s1570_s13, 1 }
  0x5a   : > { %s1696_s16 = scalar_select %p53_p4, %s1481_s11, %s55_s30  }
  0x5b   : > { %p64_p10 = por %p63_p13, %p62_p8  ;;  %p1700_p5 = por %p1911_p3, %p62_p8 }
  0x5c   : > { %s327_s28 = sand.u32 1, %s1485_s12   ;;  %s329_s29 = sand.u32 1, %s1481_s11  }
  0x5d   : > { %s1094_s24 = sshll.u32 %s329_s29, 1  ;;  %s1095_s25 = sshll.u32 %s1485_s12, 5 }
  0x5e   : > { %s1710_s21 = scalar_lea.hbm %s1888_s1, %s1095_s25  ;;  %s331_s23 = scalar_lea.vmem [#allocation5], %s1094_s24 }
  0x5f   : > { %s338_s19 = sshll.u32 %s331_s23, 4  ;;  %p1714_p11 = pnand %p1230_p6, %p64_p10  ;;  %s1712_s19 = int_to_ptr.vmem [resolvable:$true] %s338_s19 }
  0x60   : > { %s328_s9 = scalar_lea.sflag [#allocation6], %s327_s28  ;;  %s1377_s14 = scalar_lea.hbm %s1710_s21, 32 }
  0x61   : > { %p1378_p7 = scmp.ne.s32.totalorder %s1710_s21, %s1377_s14  ;;  %p1379_p9 = pneg %p1714_p11 }
  0x62   : > { %s1382_s24 = scalar_lea.hbm %s1888_s1, 64  ;;  %p1383_p1 = scmp.lt.u32.totalorder %s1710_s21, %s1888_s1 }
  0x63   : > { %p1380_p12 = pnand %p1379_p9, %p1378_p7  ;;  %p1384_p2 = scmp.lt.u32.totalorder %s1382_s24, %s1377_s14 }
  0x64   : > { %p1386_p8 = scmp.lt.u32.totalorder %s1377_s14, %s1710_s21 }
  0x65   : > { %p1381_p0 = pneg %p1380_p12  ;;  %p1385_p4 = por %p1384_p2, %p1383_p1 }
  0x67   : > { %p1387_p13 = por %p1386_p8, %p1385_p4 }
  0x69   : > { %p1388_p6 = pnand %p1387_p13, %p1381_p0 }
  0x6b   : > { %1391 = shalt.err (!%p1388_p6)
}
  0x6c   : > { %s1392_s28 = scalar_lea.vmem %s1712_s19, 32  ;;  %s1492_s18 = smov [#allocation5]  }
  0x6d   : > { %p1393_p10 = scmp.ne.s32.totalorder %s1712_s19, %s1392_s28  ;;  %s1397_s23 = sshll.u32 %s1492_s18, 4  ;;  %s1398_s23 = int_to_ptr.vmem [resolvable:$false] %s1397_s23 }
  0x6e   : > { %s1399_s30 = scalar_lea.vmem %s1398_s23, 64  ;;  %p1400_p12 = scmp.lt.s32.totalorder %s1712_s19, %s1398_s23 }
  0x6f   : > { %p1395_p3 = pnand %p1393_p10, %p1379_p9  ;;  %p1401_p1 = scmp.lt.s32.totalorder %s1399_s30, %s1392_s28 }
  0x71   : > { %p1396_p7 = pneg %p1395_p3  ;;  %p1402_p2 = por %p1401_p1, %p1400_p12 }
  0x73   : > { %p1403_p4 = pnand %p1402_p2, %p1396_p7 }
  0x75   : > { %1406 = shalt.err (!%p1403_p4)
}
  0x76   : > { %1222 = dma.hbm_to_vmem [thread:$0]  (!%p1714_p11), %s1710_s21, 32, %s1712_s19, %s328_s9  }
  0x77   : > { %p1914_p0 = scmp.ne.s32.totalorder %s1908_s17, 0 }
  0x78   : > { %p1915_p9 = scmp.eq.s32.totalorder (!%p1914_p0), %s1570_s13, 0 }
  0x79   : > { %382 = sbr.rel (%p1914_p0) target bundleno = 631 (0x277), region = 56 }
  0x80   : > { %1452 = dma.done.wait (%p1915_p9), [#allocation3], 128   ;;  %p1916_p8 = pmov %p1915_p9 }
  0x81   : > { %s388_s14 = sand.u32 1, %s1570_s13   ;;  %s1751_s29 = sand.u32 1, %s1477_s10  }
  0x82   : > { %1454 = vsyncadd (%p1916_p8), [#allocation3], 4294967168  ;;  %s1098_s22 = sshll.u32 %s1751_s29, 1  ;;  %s389_s24 = scalar_lea.sflag [#allocation6], %s388_s14 }
  0x83   : > { %s392_s25 = scalar_lea.vmem [#allocation5], %s1098_s22  ;;  %p1917_p11 = scmp.ne.s32.totalorder %s1905_s15, 0 }
  0x85   : > { %1456 = dma.done.wait (%p1917_p11), %s389_s24, 32  }
  0x86   : > { %1458 = vsyncadd (%p1917_p11), %s389_s24, 4294967264  ;;  %p1918_p13 = pmov %p1916_p8 }
  0x87   : > { %p1919_p6 = pmov %p1916_p8 }
  0x88   : > { %1460 = dma.done.wait (%p1918_p13), [#allocation6], 1024  }
  0x89   : > { %1462 = vsyncadd (%p1919_p6), [#allocation6], 4294966272  ;;  %p1920_p10 = pmov %p1919_p6 }
  0x8a   : > { %p1921_p3 = pmov %p1919_p6 }
  0x8b   : > { %1464 = dma.done.wait (%p1920_p10), [#allocation9], 1024  }
  0x8c   : > { %1466 = vsyncadd (%p1921_p3), [#allocation9], 4294966272  ;;  %v1493_v0 = vmov 0.0   ;;  %vm1494_vm0 = vmmov 0   ;;  %v1277_v1 = vld [vmem:[#allocation7] sm:$0xff]   ;;  %v1278_v2 = vld [vmem:[#allocation7 + $0x8] sm:$0xff]   ;;  %v496_v3 = vlaneseq }
  0x8d   : > { %1153 = vmatprep.subr.bf16.mxu0 %v1493_v0  ;;  %1169 = vmatprep.mubr.msk.bf16.mxu0 %vm1494_vm0, %v1493_v0  ;;  %v1495_v4 = vmov 1966171168   ;;  %v1279_v6 = vld [vmem:[#allocation7 + $0x10] sm:$0xff]   ;;  %v1280_v8 = vld [vmem:[#allocation7 + $0x18] sm:$0xff]   ;;  %v1285_v10 = vld [vmem:[#allocation8] sm:$0xff]   ;;  %p455_p7 = scmp.lt.s32.totalorder %s1570_s13, 1 }
  0x8e   : > { %1173 = vmatprep.subr.bf16.mxu1 %v1493_v0  ;;  %1189 = vmatprep.mubr.msk.bf16.mxu1 %vm1494_vm0, %v1493_v0  ;;  %v494_v5 = vunpack.c.l.s4 %v1495_v4  ;;  %v497_v7 = vshrl.u32 %v496_v3, 7  ;;  %v1107_v9 = vld.sshfl [vmem:[%s392_s25] sm:$0x11 pattern:$0x75316420]  ;;  %v1286_v12 = vld [vmem:[#allocation8 + $0x8] sm:$0xff]  }
  0x8f   : > { %1154 = vmatpush3.bf16.msra.mxu0 %v1277_v1  ;;  %1174 = vmatpush3.bf16.msra.mxu1 %v1285_v10  ;;  %v492_v13 = vcombine.high %v1107_v9, %v1107_v9  ;;  %v1281_v15 = vld [vmem:[#allocation7 + $0x20] sm:$0xff]   ;;  %v1287_v16 = vld [vmem:[#allocation8 + $0x10] sm:$0xff]   ;;  %v1282_v20 = vld [vmem:[#allocation7 + $0x28] sm:$0xff]   ;;  %s456_s15 = scalar_select %p455_p7, %s1570_s13, 1 }
  0x90   : > { %1155 = vmatprep.subr.bf16.mxu0 %v1493_v0  ;;  %v495_v11 = vunpack.c.0.s8 %v494_v5  ;;  %1175 = vmatprep.subr.bf16.mxu1 %v1493_v0  ;;  %v1780_v19 = vsub.s32 0, %v497_v7  ;;  %v1288_v21 = vld [vmem:[#allocation8 + $0x18] sm:$0xff]   ;;  %v1283_v24 = vld [vmem:[#allocation7 + $0x30] sm:$0xff]   ;;  %v1289_v26 = vld [vmem:[#allocation8 + $0x20] sm:$0xff]   ;;  %s1134_s28 = sshll.u32 %s1570_s13, 8  ;;  %s1922_s30 = sld [smem:[#allocation18_spill]] }
  0x91   : > { %v483_v25 = vld [vmem:[#allocation2] sm:$0xff]  ;;  %v1290_v31 = vld [vmem:[#allocation8 + $0x28] sm:$0xff]   ;;  %s1794_s17 = sshll.u32 %s456_s15, 1  ;;  %s911_s24 = scalar_lea.sflag [#allocation4], %s1751_s29 }
  0x92   : > { %v1774_v14 = vsub.s32 %v495_v11, %v497_v7  ;;  %v1284_v29 = vld [vmem:[#allocation7 + $0x38] sm:$0xff]   ;;  %v1291_v32 = vld [vmem:[#allocation8 + $0x30] sm:$0xff]   ;;  %s458_s9 = scalar_lea.vmem %s1889_s2, %s1794_s17  ;;  %s462_s18 = scalar_lea.vmem %s1890_s3, %s1794_s17 }
  0x93   : > { %1156 = vmatpush3.bf16.msra.mxu0 %v1278_v2  ;;  %1176 = vmatpush3.bf16.msra.mxu1 %v1286_v12  ;;  %v1292_v33 = vld [vmem:[#allocation8 + $0x38] sm:$0xff]   ;;  %v1116_v34 = vld.sshfl [vmem:[%s458_s9] sm:$0x11 pattern:$0x75316420]  ;;  %s466_s14 = scalar_lea.vmem %s1891_s4, %s1794_s17  ;;  %s470_s25 = scalar_lea.vmem %s1892_s5, %s1794_s17 }
  0x94   : > { %1157 = vmatprep.subr.bf16.mxu0 %v1493_v0  ;;  %1177 = vmatprep.subr.bf16.mxu1 %v1493_v0  ;;  %v499_v17 = vrot.slane %v1107_v9, %v1774_v14  ;;  %v506_v18 = vrot.slane %v492_v13, %v1774_v14  ;;  %v1117_v35 = vld.sshfl [vmem:[%s462_s18] sm:$0x11 pattern:$0x75316420]  ;;  %v633_v36 = vcombine.high %v1116_v34, %v1116_v34  ;;  %s474_s19 = scalar_lea.vmem %s1893_s6, %s1794_s17  ;;  %s1101_s9 = sshll.u32 %s1751_s29, 4 }
  0x95   : > { %v640_v37 = vrot.slane %v1116_v34, %v1774_v14  ;;  %v668_v38 = vcombine.high %v1117_v35, %v1117_v35  ;;  %v1118_v39 = vld.sshfl [vmem:[%s466_s14] sm:$0x11 pattern:$0x75316420]  ;;  %v675_v40 = vrot.slane %v1117_v35, %v1774_v14  ;;  %s454_s17 = scalar_lea.vmem [#allocation10], %s1101_s9  ;;  %s1496_s13 = smov [#allocation10]  }
  0x96   : > { %v510_v22 = vrot.slane %v499_v17, %v1780_v19  ;;  %v514_v23 = vrot.slane %v506_v18, %v1780_v19  ;;  %v647_v41 = vrot.slane %v633_v36, %v1774_v14  ;;  %v705_v44 = vcombine.high %v1118_v39, %v1118_v39  ;;  %v1127_v1 = vld.sshfl [vmem:[%s470_s25] sm:$0x11 pattern:$0x75316420]  ;;  %s924_s26 = sshll.u32 %s454_s17, 4  ;;  %s1923_s14 = smov %s1922_s30  ;;  %s1838_s26 = int_to_ptr.vmem [resolvable:$true] %s924_s26 }
  0x97   : > { %1158 = vmatpush3.bf16.msra.mxu0 %v1279_v6  ;;  %1178 = vmatpush3.bf16.msra.mxu1 %v1287_v16  ;;  %v651_v42 = vrot.slane %v640_v37, %v1780_v19  ;;  %v682_v43 = vrot.slane %v668_v38, %v1774_v14  ;;  %v686_v45 = vrot.slane %v675_v40, %v1780_v19  ;;  %v1128_v2 = vld.sshfl [vmem:[%s474_s19] sm:$0x11 pattern:$0x75316420]  ;;  %s1843_s22 = scalar_lea.hbm %s1922_s30, %s1134_s28  ;;  %s1407_s25 = scalar_lea.vmem %s1838_s26, 256 }
  0x98   : > { %1159 = vmatprep.subr.bf16.mxu0 %v1493_v0  ;;  %1179 = vmatprep.subr.bf16.mxu1 %v1493_v0  ;;  %v517_v27 = vmul.f32 %v510_v22, %v483_v25  ;;  %v518_v28 = vmul.f32 %v514_v23, %v483_v25  ;;  %v655_v46 = vrot.slane %v647_v41, %v1780_v19  ;;  %p1408_p12 = scmp.ne.s32.totalorder %s1838_s26, %s1407_s25  ;;  %s1411_s15 = sshll.u32 %s1496_s13, 4  ;;  %s1412_s15 = int_to_ptr.vmem [resolvable:$false] %s1411_s15 }
  0x99   : > { %v712_v49 = vrot.slane %v1118_v39, %v1774_v14  ;;  %v690_v51 = vrot.slane %v682_v43, %v1780_v19  ;;  %v719_v52 = vrot.slane %v705_v44, %v1774_v14  ;;  %v846_v3 = vcombine.high %v1127_v1, %v1127_v1  ;;  %s1413_s21 = scalar_lea.vmem %s1412_s15, 512  ;;  %p1414_p4 = scmp.lt.s32.totalorder %s1838_s26, %s1412_s15 }
  0x9a   : > { %v519_v30 = vpack.c.bf16 %v518_v28, %v517_v27  ;;  %v853_v4 = vrot.slane %v1127_v1, %v1774_v14  ;;  %v881_v5 = vcombine.high %v1128_v2, %v1128_v2  ;;  %v888_v6 = vrot.slane %v1128_v2, %v1774_v14  ;;  %p1409_p1 = pnand %p1408_p12, %p1700_p5  ;;  %p1415_p0 = scmp.lt.s32.totalorder %s1413_s21, %s1407_s25 }
  0x9b   : > { %1160 = vmatpush3.bf16.msra.mxu0 %v1280_v8  ;;  %1180 = vmatpush3.bf16.msra.mxu1 %v1288_v21  ;;  %v723_v58 = vrot.slane %v712_v49, %v1780_v19  ;;  %v727_v60 = vrot.slane %v719_v52, %v1780_v19  ;;  %v860_v7 = vrot.slane %v846_v3, %v1774_v14 }
  0x9c   : > { %1161 = vmatprep.subr.bf16.mxu0 %v1493_v0  ;;  %1181 = vmatprep.subr.bf16.mxu1 %v1493_v0  ;;  %v864_v8 = vrot.slane %v853_v4, %v1780_v19  ;;  %v895_v9 = vrot.slane %v881_v5, %v1774_v14  ;;  %v899_v10 = vrot.slane %v888_v6, %v1780_v19  ;;  %p1410_p2 = pneg %p1409_p1  ;;  %p1416_p9 = por %p1415_p0, %p1414_p4 }
  0x9d   : > { %v868_v11 = vrot.slane %v860_v7, %v1780_v19 }
  0x9e   : > { %v903_v16 = vrot.slane %v895_v9, %v1780_v19  ;;  %p1417_p8 = pnand %p1416_p9, %p1410_p2 }
  0x9f   : > { %1162 = vmatpush3.bf16.msra.mxu0 %v1281_v15  ;;  %1182 = vmatpush3.bf16.msra.mxu1 %v1289_v26 }
  0xa0   : > { %1163 = vmatprep.subr.bf16.mxu0 %v1493_v0  ;;  %1183 = vmatprep.subr.bf16.mxu1 %v1493_v0 }
  0xa3   : > { %1164 = vmatpush3.bf16.msra.mxu0 %v1282_v20  ;;  %1184 = vmatpush3.bf16.msra.mxu1 %v1290_v31 }
  0xa4   : > { %1165 = vmatprep.subr.bf16.mxu0 %v1493_v0  ;;  %1185 = vmatprep.subr.bf16.mxu1 %v1493_v0 }
  0xa7   : > { %1166 = vmatpush3.bf16.msra.mxu0 %v1283_v24  ;;  %1186 = vmatpush3.bf16.msra.mxu1 %v1291_v32 }
  0xa8   : > { %1167 = vmatprep.subr.bf16.mxu0 %v1493_v0  ;;  %1187 = vmatprep.subr.bf16.mxu1 %v1493_v0 }
  0xab   : > { %1168 = vmatpush3.bf16.msra.mxu0 %v1284_v29  ;;  %1188 = vmatpush3.bf16.msra.mxu1 %v1292_v33 }
  0xae   : > { %1170 = vmatmul.mubr.bf16.vlgmr.msra.gmra.mrb[0].mxu0 %v519_v30 }
 0x181   : > { %v618_v47 = vpop.f32.mrb[0].mxu0 }
 0x182   : > { %v658_v48 = vmul.f32 %v651_v42, %v618_v47  ;;  %v1171_v50 = vpop.f32.mrb[1].mxu0 }
 0x183   : > { %v621_v53 = vpop.f32.mrb[2].mxu0 }
 0x184   : > { %v693_v54 = vadd.f32 %v686_v45, %v658_v48  ;;  %v659_v55 = vmul.f32 %v655_v46, %v621_v53  ;;  %v1172_v56 = vpop.f32.mrb[3].mxu0 }
 0x186   : > { %v695_v57 = vmax.f32 %v693_v54, 0.0  ;;  %v694_v59 = vadd.f32 %v690_v51, %v659_v55 }
 0x188   : > { %v696_v61 = vmax.f32 %v694_v59, 0.0  ;;  %v730_v62 = vmul.f32 %v723_v58, %v695_v57 }
 0x18a   : > { %v731_v63 = vmul.f32 %v727_v60, %v696_v61 }
 0x18c   : > { %v732_v0 = vpack.c.bf16 %v731_v63, %v730_v62 }
 0x18e   : > { %1190 = vmatmul.mubr.bf16.vlgmr.msra.gmra.mrb[0].mxu1 %v732_v0 }
 0x261   : > { %v831_v12 = vpop.f32.mrb[0].mxu1 }
 0x262   : > { %v871_v13 = vmul.f32 %v864_v8, %v831_v12  ;;  %v1191_v15 = vpop.f32.mrb[1].mxu1 }
 0x263   : > { %v834_v17 = vpop.f32.mrb[2].mxu1 }
 0x264   : > { %v906_v18 = vadd.f32 %v899_v10, %v871_v13  ;;  %v872_v14 = vmul.f32 %v868_v11, %v834_v17  ;;  %v1192_v20 = vpop.f32.mrb[3].mxu1 }
 0x266   : > { %908 = vst [vmem:[%s454_s17] sm:$0xff] %v906_v18  ;;  %v907_v21 = vadd.f32 %v903_v16, %v872_v14 }
 0x268   : > { %909 = vst [vmem:[%s454_s17 + $0x8] sm:$0xff] %v907_v21 }
 0x269   : > { %1420 = shalt.err (!%p1417_p8)
}
 0x26a   : > { %s1421_s19 = scalar_lea.hbm %s1843_s22, 256  ;;  %s1425_s28 = scalar_lea.hbm %s1923_s14, 512 }
 0x26b   : > { %p1422_p11 = scmp.ne.s32.totalorder %s1843_s22, %s1421_s19  ;;  %p1426_p10 = scmp.lt.u32.totalorder %s1843_s22, %s1923_s14 }
 0x26c   : > { %p1427_p3 = scmp.lt.u32.totalorder %s1425_s28, %s1421_s19  ;;  %p1429_p12 = scmp.lt.u32.totalorder %s1421_s19, %s1843_s22 }
 0x26d   : > { %p1423_p13 = pnand %p1422_p11, %p1700_p5 }
 0x26e   : > { %p1428_p7 = por %p1427_p3, %p1426_p10 }
 0x26f   : > { %p1424_p6 = pneg %p1423_p13 }
 0x270   : > { %p1430_p1 = por %p1429_p12, %p1428_p7 }
 0x272   : > { %p1431_p2 = pnand %p1430_p1, %p1424_p6 }
 0x274   : > { %1434 = shalt.err (!%p1431_p2)
}
 0x275   : > { %s1497_s30 = smov 128   ;;  %s1498_s25 = smov 8  }
 0x276   : > { %1207 = dma.vmem_to_hbm [thread:$0]  (%p1700_p5), %s1838_s26, 256, %s1843_s22, %s911_s24, %s1497_s30, %s1497_s30, %s1498_s25  }
 0x277 PF: > { %s1924_s13 = sld [smem:[#allocation16_spill]]  ;;  %s1925_s15 = sld [smem:[#allocation17_spill]] }
 0x278   : > { %p1927_p0 = scmp.ge.s32.totalorder %s1485_s12, 2 }
 0x27d   : > { %s939_s21 = sand.u32 1, %s1924_s13   ;;  %p1926_p4 = scmp.ne.s32.totalorder %s1925_s15, 0 }
 0x27e   : > { %s940_s19 = scalar_lea.sflag [#allocation4], %s939_s21 }
 0x27f   : > { %p1224_p9 = pnand %p1927_p0, %p1926_p4 }
 0x281   : > { %1468 = dma.done.wait (!%p1224_p9), %s940_s19, 256  }
 0x282   : > { %1470 = vsyncadd (!%p1224_p9), %s940_s19, 4294967040  ;;  %p24_p8 = scmp.ge.s32.totalorder %s1686_s20, 4   ;;  %s1928_s30 = smov %s1477_s10 }
 0x283   : > { %s1929_s10 = smov %s1481_s11  ;;  %s1930_s11 = smov %s1696_s16 }
 0x284   : > { %s1931_s12 = smov %s1686_s20  ;;  %26 = sbr.rel (!%p24_p8) target bundleno = 9 (0x9), region = 129 }
 0x28b   :  { %945 = vsyncpa [#allocation3], 1 }
 0x28c   :  { %947 = vsyncpa [#allocation3 + $0x1], 1 }
 0x28d   :  { %948 = vsyncpa [#allocation6], 1 }
 0x28e   :  { %950 = vsyncpa [#allocation6 + $0x1], 1 }
 0x28f   :  { %951 = vsyncpa [#allocation9], 1 }
 0x290   :  { %952 = vsyncpa [#allocation4], 1 }
 0x291   :  { %954 = vsyncpa [#allocation4 + $0x1], 1 }

</bundles_post_ra>
